<compile_context>
chip_gen: v5e
topology: v5e:2x2
jax: 0.10.0
libtpu: 0.0.40
codegen_flags: <defaults>
</compile_context>

<pallas_src>
import functools

import jax
import jax.numpy as jnp
from jax import lax
from jax.experimental import pallas as pl
from jax.experimental.pallas import tpu as pltpu

BN_EPS = 1e-5
MAX_TILE_B = 2048  # multiple of 128; sweep 1024-4096 per generation if desired


def _round_up(x, m):
    return ((x + m - 1) // m) * m


def _sigmoid(z):
    # EUP tanh + one FMA; mathematically identical to 1/(1+exp(-z)).
    return 0.5 * (jnp.tanh(0.5 * z) + 1.0)


def fnn_kernel(x_ref, w1_ref, b1_ref, w2_ref, b2_ref, w3_ref, o_ref):
    # x tile: [tile_b, input_size] f32, cast to bf16 here (cheap VPU op hidden
    # under the DMA); weights bf16; biases / BN-folded terms f32.
    x = x_ref[...].astype(jnp.bfloat16)

    # fc1 (Dropout = identity at inference): Linear -> Sigmoid
    h = jnp.dot(x, w1_ref[...], preferred_element_type=jnp.float32) + b1_ref[...]
    h = _sigmoid(h)

    # fc2 with BN1 folded into w2/b2: Linear -> Sigmoid
    h = jnp.dot(h.astype(w2_ref.dtype), w2_ref[...],
                preferred_element_type=jnp.float32) + b2_ref[...]
    h = _sigmoid(h)

    # fc3 with BN2 folded into w3 (out_features == 1):
    #   (1, n_l2) . (tile_b, n_l2)^T -> (1, tile_b)
    # Rides the otherwise-idle MXU and lands directly in the lane-dense output
    # layout (contiguous store/writeback instead of masked per-row stores).
    row = lax.dot_general(
        w3_ref[...], h,
        dimension_numbers=(((1,), (1,)), ((), ())),
        preferred_element_type=jnp.float32)
    o_ref[...] = row.astype(o_ref.dtype)


def _pick_tile_b(batch, max_tile_b):
    if batch <= 128:
        # Single block equal to the whole array: block dims == array dims, so
        # no (8,128) divisibility requirement applies.
        return batch
    # >= 2 blocks so ("parallel",) can shard across v7x's 2 TCs; tile stays a
    # multiple of 128 (lane-dense output store, bf16 sublane tiling) and never
    # exceeds the batch dimension.
    return min(max_tile_b, _round_up(pl.cdiv(batch, 2), 128))


@functools.partial(jax.jit, static_argnames=("max_tile_b",))
def fnn_forward(x, fp, max_tile_b=MAX_TILE_B):
    """x: [B, input_size] float32.  fp: dict of folded params (see fold_params)."""
    B, D = x.shape
    tile_b = _pick_tile_b(B, max_tile_b)
    n_blocks = pl.cdiv(B, tile_b)
    b_pad = n_blocks * tile_b

    w1, b1 = fp["w1"], fp["b1"]
    w2, b2 = fp["w2"], fp["b2"]
    w3r, b3 = fp["w3_row"], fp["b3"]

    const = lambda i: (0, 0)  # weights/biases stay VMEM-resident across the grid
    # TODO(synk): for very large n_l1/n_l2 on v7x, add pipeline_mode=pl.Buffered(1)
    # to these constant-index weight specs to drop their default double-buffering.
    out_row = pl.pallas_call(
        fnn_kernel,
        out_shape=jax.ShapeDtypeStruct((1, b_pad), jnp.float32),
        grid=(n_blocks,),
        in_specs=[
            pl.BlockSpec((tile_b, D), lambda i: (i, 0)),
            pl.BlockSpec(w1.shape, const),
            pl.BlockSpec(b1.shape, const),
            pl.BlockSpec(w2.shape, const),
            pl.BlockSpec(b2.shape, const),
            pl.BlockSpec(w3r.shape, const),
        ],
        out_specs=pl.BlockSpec((1, tile_b), lambda i: (0, i)),
        compiler_params=pltpu.CompilerParams(
            dimension_semantics=("parallel",),
            vmem_limit_bytes=48 * 1024 * 1024,
        ),
    )(x, w1, b1, w2, b2, w3r)

    # Columns in [B, b_pad) came from the ragged last block's OOB reads; drop
    # them.  b3 (1,1) is added here instead of wasting a padded VMEM block.
    return out_row[0, :B].reshape(B, 1) + b3


def init_params(key, input_size, n_l1, n_l2):
    """Deterministic init mirroring the PyTorch module's __init__ (inference mode)."""
    def xavier_uniform(k, fan_in, fan_out):
        limit = jnp.sqrt(6.0 / (fan_in + fan_out))
        # stored as [in, out] (transposed vs. PyTorch's [out, in])
        return jax.random.uniform(k, (fan_in, fan_out), jnp.float32, -limit, limit)

    def linear_bias(k, fan_in, fan_out):
        bound = 1.0 / jnp.sqrt(fan_in)
        return jax.random.uniform(k, (1, fan_out), jnp.float32, -bound, bound)

    ks = jax.random.split(key, 6)
    return {
        "w1": xavier_uniform(ks[0], input_size, n_l1),
        "b1": linear_bias(ks[1], input_size, n_l1),
        "g1": jnp.ones((1, n_l1), jnp.float32),     # BN weight filled with 1
        "be1": jnp.zeros((1, n_l1), jnp.float32),   # BN bias zeroed
        "m1": jnp.zeros((1, n_l1), jnp.float32),    # running_mean
        "v1": jnp.ones((1, n_l1), jnp.float32),     # running_var
        "w2": xavier_uniform(ks[2], n_l1, n_l2),
        "b2": linear_bias(ks[3], n_l1, n_l2),
        "g2": jnp.ones((1, n_l2), jnp.float32),
        "be2": jnp.zeros((1, n_l2), jnp.float32),
        "m2": jnp.zeros((1, n_l2), jnp.float32),
        "v2": jnp.ones((1, n_l2), jnp.float32),
        "w3": xavier_uniform(ks[4], n_l2, 1),
        "b3": linear_bias(ks[5], n_l2, 1),
    }


def fold_params(p):
    """Fold inference-mode BatchNorms into the following Linear layers (exact)."""
    s1 = p["g1"] / jnp.sqrt(p["v1"] + BN_EPS)          # (1, n_l1)
    t1 = p["be1"] - p["m1"] * s1
    s2 = p["g2"] / jnp.sqrt(p["v2"] + BN_EPS)          # (1, n_l2)
    t2 = p["be2"] - p["m2"] * s2

    w2f = s1.reshape(-1, 1) * p["w2"]                  # (n_l1, n_l2)
    b2f = p["b2"] + t1 @ p["w2"]                       # (1, n_l2)
    w3f = s2.reshape(-1, 1) * p["w3"]                  # (n_l2, 1)
    b3f = p["b3"] + t2 @ p["w3"]                       # (1, 1)

    return {
        "w1": p["w1"].astype(jnp.bfloat16),
        "b1": p["b1"].astype(jnp.float32),
        "w2": w2f.astype(jnp.bfloat16),
        "b2": b2f.astype(jnp.float32),
        "w3_row": w3f.T.astype(jnp.float32),           # (1, n_l2), f32 MXU row-dot
        "b3": b3f.astype(jnp.float32),
    }


def fnn_reference(x, p):
    """Pure-JAX f32 reference (unfolded) for correctness check."""
    h = jax.nn.sigmoid(x @ p["w1"] + p["b1"])
    h = (h - p["m1"]) / jnp.sqrt(p["v1"] + BN_EPS) * p["g1"] + p["be1"]
    h = jax.nn.sigmoid(h @ p["w2"] + p["b2"])
    h = (h - p["m2"]) / jnp.sqrt(p["v2"] + BN_EPS) * p["g2"] + p["be2"]
    return h @ p["w3"] + p["b3"]


# TODO(synk): training-mode Dropout (stochastic masking) and batch-stat BatchNorm
# are not implemented; this kernel is the inference forward pass.

if __name__ == "__main__":
    key = jax.random.PRNGKey(0)
    kx, kp = jax.random.split(key)

    batch, input_size, n_l1, n_l2 = 8, 32, 64, 32
    x = jax.random.normal(kx, (batch, input_size), jnp.float32)
    params = init_params(kp, input_size, n_l1, n_l2)
    folded = fold_params(params)

    # Small batch: single block equal to the whole array.
    out = jax.block_until_ready(fnn_forward(x, folded))
    ref = fnn_reference(x, params)
    assert out.shape == (batch, 1), out.shape
    assert bool(jnp.all(jnp.isfinite(out)))
    assert jnp.allclose(out, ref, atol=2e-2, rtol=2e-2)

    # Non-divisible batch: 2 blocks, ragged last block (OOB-read rows dropped).
    x2 = jax.random.normal(jax.random.PRNGKey(1), (300, input_size), jnp.float32)
    out2 = jax.block_until_ready(fnn_forward(x2, folded))
    ref2 = fnn_reference(x2, params)
    assert out2.shape == (300, 1), out2.shape
    assert bool(jnp.all(jnp.isfinite(out2)))
    assert jnp.allclose(out2, ref2, atol=2e-2, rtol=2e-2)

    # Larger batch: hits the MAX_TILE_B cap, 3 blocks, ragged last block.
    x3 = jax.random.normal(jax.random.PRNGKey(2), (5000, input_size), jnp.float32)
    out3 = jax.block_until_ready(fnn_forward(x3, folded))
    ref3 = fnn_reference(x3, params)
    assert out3.shape == (5000, 1), out3.shape
    assert bool(jnp.all(jnp.isfinite(out3)))
    assert jnp.allclose(out3, ref3, atol=2e-2, rtol=2e-2)

    print("KERNEL_OK")
</pallas_src>

<mosaic_0001>
module attributes {stable_mosaic.version = 11 : i64} {
  func.func @fnn_kernel(%arg0: i32, %arg1: memref<8x32xf32, #tpu.memory_space<vmem>>, %arg2: memref<32x64xbf16, #tpu.memory_space<vmem>>, %arg3: memref<1x64xf32, #tpu.memory_space<vmem>>, %arg4: memref<64x32xbf16, #tpu.memory_space<vmem>>, %arg5: memref<1x32xf32, #tpu.memory_space<vmem>>, %arg6: memref<1x32xf32, #tpu.memory_space<vmem>>, %arg7: memref<1x8xf32, #tpu.memory_space<vmem>>) attributes {dimension_semantics = [#tpu.dimension_semantics<parallel>], iteration_bounds = array<i64: 1>, scalar_prefetch = 0 : i64, scratch_operands = 0 : i64, tpu.core_type = #tpu.core_type<tc>, window_params = [{transform_indices = @transform_0, window_bounds = array<i64: 8, 32>}, {pipeline_mode = #tpu.pipeline_mode<synchronous>, transform_indices = @transform_1, window_bounds = array<i64: 32, 64>}, {pipeline_mode = #tpu.pipeline_mode<synchronous>, transform_indices = @transform_2, window_bounds = array<i64: 1, 64>}, {pipeline_mode = #tpu.pipeline_mode<synchronous>, transform_indices = @transform_3, window_bounds = array<i64: 64, 32>}, {pipeline_mode = #tpu.pipeline_mode<synchronous>, transform_indices = @transform_4, window_bounds = array<i64: 1, 32>}, {pipeline_mode = #tpu.pipeline_mode<synchronous>, transform_indices = @transform_5, window_bounds = array<i64: 1, 32>}, {transform_indices = @transform_6, window_bounds = array<i64: 1, 8>}]} {
    %c0 = arith.constant 0 : index
    %c0_0 = arith.constant 0 : index
    %0 = vector.load %arg1[%c0, %c0_0] : memref<8x32xf32, #tpu.memory_space<vmem>>, vector<8x32xf32>
    %1 = arith.truncf %0 : vector<8x32xf32> to vector<8x32xbf16>
    %c0_1 = arith.constant 0 : index
    %c0_2 = arith.constant 0 : index
    %2 = vector.load %arg2[%c0_1, %c0_2] : memref<32x64xbf16, #tpu.memory_space<vmem>>, vector<32x64xbf16>
    %cst = arith.constant dense<0.000000e+00> : vector<8x64xf32>
    %3 = tpu.matmul %1, %2, %cst {dimension_numbers = #tpu.dot_dimension_numbers<[1], [0], [0], [1], [0, 0, 1, 1], [], []>} : vector<8x32xbf16>, vector<32x64xbf16>, vector<8x64xf32> -> vector<8x64xf32>
    %c0_3 = arith.constant 0 : index
    %c0_4 = arith.constant 0 : index
    %4 = vector.load %arg3[%c0_3, %c0_4] : memref<1x64xf32, #tpu.memory_space<vmem>>, vector<1x64xf32>
    %5 = vector.broadcast %4 : vector<1x64xf32> to vector<8x64xf32>
    %6 = arith.addf %3, %5 : vector<8x64xf32>
    %cst_5 = arith.constant 5.000000e-01 : f32
    %7 = vector.broadcast %cst_5 : f32 to vector<8x64xf32>
    %8 = arith.mulf %7, %6 : vector<8x64xf32>
    %9 = math.tanh %8 : vector<8x64xf32>
    %cst_6 = arith.constant 1.000000e+00 : f32
    %10 = vector.broadcast %cst_6 : f32 to vector<8x64xf32>
    %11 = arith.addf %9, %10 : vector<8x64xf32>
    %cst_7 = arith.constant 5.000000e-01 : f32
    %12 = vector.broadcast %cst_7 : f32 to vector<8x64xf32>
    %13 = arith.mulf %12, %11 : vector<8x64xf32>
    %14 = arith.truncf %13 : vector<8x64xf32> to vector<8x64xbf16>
    %c0_8 = arith.constant 0 : index
    %c0_9 = arith.constant 0 : index
    %15 = vector.load %arg4[%c0_8, %c0_9] : memref<64x32xbf16, #tpu.memory_space<vmem>>, vector<64x32xbf16>
    %cst_10 = arith.constant dense<0.000000e+00> : vector<8x32xf32>
    %16 = tpu.matmul %14, %15, %cst_10 {dimension_numbers = #tpu.dot_dimension_numbers<[1], [0], [0], [1], [0, 0, 1, 1], [], []>} : vector<8x64xbf16>, vector<64x32xbf16>, vector<8x32xf32> -> vector<8x32xf32>
    %c0_11 = arith.constant 0 : index
    %c0_12 = arith.constant 0 : index
    %17 = vector.load %arg5[%c0_11, %c0_12] : memref<1x32xf32, #tpu.memory_space<vmem>>, vector<1x32xf32>
    %18 = vector.broadcast %17 : vector<1x32xf32> to vector<8x32xf32>
    %19 = arith.addf %16, %18 : vector<8x32xf32>
    %cst_13 = arith.constant 5.000000e-01 : f32
    %20 = vector.broadcast %cst_13 : f32 to vector<8x32xf32>
    %21 = arith.mulf %20, %19 : vector<8x32xf32>
    %22 = math.tanh %21 : vector<8x32xf32>
    %cst_14 = arith.constant 1.000000e+00 : f32
    %23 = vector.broadcast %cst_14 : f32 to vector<8x32xf32>
    %24 = arith.addf %22, %23 : vector<8x32xf32>
    %cst_15 = arith.constant 5.000000e-01 : f32
    %25 = vector.broadcast %cst_15 : f32 to vector<8x32xf32>
    %26 = arith.mulf %25, %24 : vector<8x32xf32>
    %c0_16 = arith.constant 0 : index
    %c0_17 = arith.constant 0 : index
    %27 = vector.load %arg6[%c0_16, %c0_17] : memref<1x32xf32, #tpu.memory_space<vmem>>, vector<1x32xf32>
    %cst_18 = arith.constant dense<0.000000e+00> : vector<1x8xf32>
    %28 = tpu.matmul %27, %26, %cst_18 {dimension_numbers = #tpu.dot_dimension_numbers<[1], [1], [0], [0], [0, 0, 1, 0], [], []>} : vector<1x32xf32>, vector<8x32xf32>, vector<1x8xf32> -> vector<1x8xf32>
    %c0_19 = arith.constant 0 : index
    %c0_20 = arith.constant 0 : index
    %29 = vector.load %arg7[%c0_19, %c0_20] : memref<1x8xf32, #tpu.memory_space<vmem>>, vector<1x8xf32>
    tpu.vector_store %arg7[%c0_19, %c0_20], %28 {strides = array<i32>} : memref<1x8xf32, #tpu.memory_space<vmem>>, vector<1x8xf32>,
    return
  }
  func.func @transform_0(%arg0: i32) -> (i32, i32) {
    %c0_i32 = arith.constant 0 : i32
    %c0_i32_0 = arith.constant 0 : i32
    return %arg0, %c0_i32 : i32, i32
  }
  func.func @transform_1(%arg0: i32) -> (i32, i32) {
    %c0_i32 = arith.constant 0 : i32
    %c0_i32_0 = arith.constant 0 : i32
    %c0_i32_1 = arith.constant 0 : i32
    return %c0_i32, %c0_i32_0 : i32, i32
  }
  func.func @transform_2(%arg0: i32) -> (i32, i32) {
    %c0_i32 = arith.constant 0 : i32
    %c0_i32_0 = arith.constant 0 : i32
    %c0_i32_1 = arith.constant 0 : i32
    return %c0_i32, %c0_i32_0 : i32, i32
  }
  func.func @transform_3(%arg0: i32) -> (i32, i32) {
    %c0_i32 = arith.constant 0 : i32
    %c0_i32_0 = arith.constant 0 : i32
    %c0_i32_1 = arith.constant 0 : i32
    return %c0_i32, %c0_i32_0 : i32, i32
  }
  func.func @transform_4(%arg0: i32) -> (i32, i32) {
    %c0_i32 = arith.constant 0 : i32
    %c0_i32_0 = arith.constant 0 : i32
    %c0_i32_1 = arith.constant 0 : i32
    return %c0_i32, %c0_i32_0 : i32, i32
  }
  func.func @transform_5(%arg0: i32) -> (i32, i32) {
    %c0_i32 = arith.constant 0 : i32
    %c0_i32_0 = arith.constant 0 : i32
    %c0_i32_1 = arith.constant 0 : i32
    return %c0_i32, %c0_i32_0 : i32, i32
  }
  func.func @transform_6(%arg0: i32) -> (i32, i32) {
    %c0_i32 = arith.constant 0 : i32
    %c0_i32_0 = arith.constant 0 : i32
    return %c0_i32, %arg0 : i32, i32
  }
}

</mosaic_0001>

<bundles_post_ra>
// kernel: fnn_forward.1
= control target key start
LH: loop header
LB: loop body
LE: loop exit
PB: predicated region body
PF: predicated region fallthrough
CT: control target
= control target key end

     0   :  { %vm46_vm0 = vcmask 261120   ;;  %vm104_vm1 = vcmask 523264   ;;  %vm152_vm2 = vcmask 57344   ;;  %s269_s1 = inlined_call_operand.vmem [shape: bf16[32,64], index: 1, kind: input, shape index: {}]   ;;  %s270_s0 = inlined_call_operand.vmem [shape: f32[8,32], index: 0, kind: input, shape index: {}]   ;;  %s271_s2 = inlined_call_operand.vmem [shape: f32[1,64], index: 2, kind: input, shape index: {}]   ;;  %s272_s4 = inlined_call_operand.vmem [shape: f32[1,32], index: 4, kind: input, shape index: {}]   ;;  %s273_s3 = inlined_call_operand.vmem [shape: bf16[64,32], index: 3, kind: input, shape index: {}]   ;;  %s274_s5 = inlined_call_operand.vmem [shape: f32[1,32], index: 5, kind: input, shape index: {}]   ;;  %s275_s6 = inlined_call_operand.vmem [shape: f32[1,8], index: 6, kind: output, shape index: {}]  }
   0x1   :  { %v187_v0 = vld [vmem:[%s269_s1 + $0x8] sm:$0xff]  ;;  %v186_v1 = vld [vmem:[%s269_s1] sm:$0xff]  ;;  %v191_v4 = vld [vmem:[%s273_s3 + $0x18] sm:$0xff] }
   0x2   :  { %56 = vmatpush.bf16.msra.mxu0 %v187_v0  ;;  %v24_v2 = vld [vmem:[%s270_s0] sm:$0xff]  ;;  %112 = vmatpush.bf16.msra.mxu1 %v191_v4  ;;  %v190_v5 = vld [vmem:[%s273_s3 + $0x10] sm:$0xff]  ;;  %v189_v6 = vld [vmem:[%s273_s3 + $0x8] sm:$0xff] }
   0x3   :  { %v25_v3 = vpack.c.bf16 %v24_v2, %v24_v2  ;;  %v188_v7 = vld [vmem:[%s273_s3] sm:$0xff] }
   0x4   :  { %v192_v8 = vld [vmem:[%s271_s2] ss:$0 sm:$0xff] }
   0x5   :  { %v193_v17 = vld [vmem:[%s272_s4] ss:$0 sm:$0xff] }
   0x6   :  { %57 = vmatpush.bf16.msra.mxu0 %v186_v1  ;;  %113 = vmatpush.bf16.msra.mxu1 %v190_v5  ;;  %v125_v25 = vld [vmem:[%s274_s5] sm:$0x1] }
   0x9   :  { %166 = vmatmul.msk.bf16.vlgmr.msra.gmra.mxu0 %vm46_vm0, %v25_v3 }
   0xa   :  { %114 = vmatpush.bf16.msra.mxu1 %v189_v6 }
   0xe   :  { %115 = vmatpush.bf16.msra.mxu1 %v188_v7 }
  0x86   :  { %v59_v9 = vpop.f32.mrf.mxu0 }
  0x87   :  { %v60_v10 = vadd.f32 %v192_v8, %v59_v9 }
  0x89   :  { %v63_v11 = vmul.f32 0.5, %v60_v10 }
  0x8b   :  { %194 = vtanh.f32 %v63_v11 }
  0x8e   :  { %v61_v12 = vpop.f32.mrf.mxu0 }
  0x91   :  { %v195_v13 = vpop.eup %194 }
  0x92   :  { %v65_v14 = vadd.f32 1.0, %v195_v13 }
  0x94   :  { %v66_v15 = vmul.f32 0.5, %v65_v14 }
  0x96   :  { %v67_v16 = vpack.c.bf16 %v66_v15, %v66_v15 }
  0x98   :  { %183 = vmatmul.msk.bf16.vlgmr.msra.gmra.mxu1 %vm104_vm1, %v67_v16 }
 0x115   :  { %v117_v18 = vpop.f32.mrf.mxu1 }
 0x116   :  { %v118_v19 = vadd.f32 %v193_v17, %v117_v18 }
 0x118   :  { %v121_v20 = vmul.f32 0.5, %v118_v19 }
 0x11a   :  { %196 = vtanh.f32 %v121_v20 }
 0x11d   :  { %v119_v21 = vpop.f32.mrf.mxu1 }
 0x120   :  { %v197_v22 = vpop.eup %196 }
 0x121   :  { %v123_v23 = vadd.f32 1.0, %v197_v22 }
 0x123   :  { %v124_v24 = vmul.f32 0.5, %v123_v23 }
 0x125   :  { %184 = vmatpush.xpose.msk.msra.mxu2 %vm46_vm0, %v124_v24 }
 0x128   :  { %185 = vmatmul.msk.f32.vlgmr.msra.gmra.mxu2 %vm46_vm0, %v125_v25 }
 0x1ab   :  { %v149_v26 = vpop.f32.mrf.mxu2 }
 0x1ac   :  { %153 = vst.msk [vmem:[%s275_s6] sm:$0x1] %vm152_vm2, %v149_v26 }

</bundles_post_ra>
